<compile_context>
chip_gen: v7x
topology: tpu7x:2x2x1
jax: 0.10.0
libtpu: 0.0.40
codegen_flags: <defaults>
</compile_context>

<pallas_src>
import math
from functools import partial

import jax
import jax.numpy as jnp
from jax.experimental import pallas as pl
from jax.experimental.pallas import tpu as pltpu


def _modulation_kernel(t_ref, m_ref, x_ref, o_ref, *, shift, g):
    # t_ref: (TILE_L, g)    f32     time/position block (lane-padded in VMEM)
    # m_ref: (g, g*D)       f32     resident expansion of -|deltas|
    # x_ref: (TILE_L, g*D)  x.dtype streamed
    t = t_ref[...]
    m = m_ref[...]
    x = x_ref[...].astype(jnp.float32)          # f32 in-vreg compute (v5e-safe)
    if g == 1:
        expo = t * m                            # (TILE_L,1)*(1,D) VPU broadcast
    else:
        # Expand the g per-row time values across the 128 lanes via a tiny
        # matmul against the block-diagonal -|deltas| matrix (MXU; free here).
        expo = jnp.dot(t, m, preferred_element_type=jnp.float32)
    decay = jnp.exp(expo)                       # EUP
    o_ref[...] = (x * (decay + shift)).astype(o_ref.dtype)


def _vmem_capacity_bytes():
    """Best-effort VMEM capacity query; conservative 64 MiB fallback (v7x-class)."""
    try:
        return int(pltpu.get_tpu_info().vmem_capacity_bytes)
    except Exception:
        pass
    try:
        kind = jax.devices()[0].device_kind.lower()
        if "v5" in kind or "v6" in kind:
            return 128 << 20
    except Exception:
        pass
    return 64 << 20


def exponential_modulation(t, x, deltas, *, shift=0.05, modulate=True,
                           donate_x=False):
    """t broadcastable to [B, L, 1] (typically [1, L, 1]); x [B, L, D]; deltas [1, 1, D].

    Set donate_x=True only when the caller's x is dead after this call (x must be
    contiguous so its reshape is a bitcast) to reuse x's HBM buffer for the output.
    """
    if not modulate:
        return x

    B, L, D = x.shape
    itemsize = jnp.dtype(x.dtype).itemsize
    sub = 16 if itemsize == 2 else 8

    # --- lane-dense regrouping for D < 128 (pure layout plumbing, no HBM pass) ---
    g = 1
    if D < 128 and 128 % D == 0 and L % (128 // D) == 0:
        g = 128 // D
    Lg, gD = L // g, g * D

    # t: keep its stored batch dim (1 or B); never materialize the batch broadcast.
    t_arr = jnp.asarray(t, jnp.float32).reshape(-1, L)
    Bt = t_arr.shape[0]
    if Bt not in (1, B):
        raise ValueError(f"t batch dim {Bt} incompatible with x batch {B}")
    t_g = t_arr.reshape(Bt, Lg, g)

    # -|deltas| expanded to a tiny resident (g, g*D) lane-expansion matrix:
    # m[k, k*D + d] = -|deltas[d]|, zeros elsewhere.
    nad = (-jnp.abs(jnp.asarray(deltas, jnp.float32))).reshape(D)
    if g == 1:
        m = nad.reshape(1, D)
    else:
        m = (jnp.eye(g, dtype=jnp.float32)[:, :, None] * nad[None, None, :]
             ).reshape(g, gD)

    x_g = x.reshape(B, Lg, gD)

    # --- generation-aware tile / VMEM sizing (kernel is purely mem-bound) ---
    vmem_cap = _vmem_capacity_bytes()
    if vmem_cap >= (96 << 20):        # v5e / v6e class: 128 MiB physical VMEM
        block_budget = 64 << 20       # budget for the double-buffered blocks
        ceiling = 100 << 20
    else:                             # v7x class: 64 MiB physical VMEM
        block_budget = 28 << 20
        ceiling = 46 << 20

    # Per-row double-buffered VMEM: x in + x out (native dtype) + t block,
    # which is lane-padded to 128 f32 lanes in VMEM regardless of g.
    row_bytes = 2 * gD * itemsize + 128 * 4
    tile_l = block_budget // (2 * row_bytes)
    # Keep >= ~8 total grid steps so DMA/compute pipelining works and both
    # v7x TensorCores get balanced work (best-effort on small problems).
    min_lt = max(1, -(-8 // B))
    if Lg >= min_lt * sub:
        tile_l = min(tile_l, Lg // min_lt)
    tile_l = max(sub, (tile_l // sub) * sub)
    if tile_l >= Lg:
        tile_l = Lg                   # full extent (bypasses (8,128) divisibility)
    n_lt = pl.cdiv(Lg, tile_l)

    m_pad_bytes = max(g, 8) * max(gD, 128) * 4
    need = 2 * tile_l * row_bytes + 2 * m_pad_bytes + (8 << 20)   # + margin
    vmem_limit = int(min(ceiling, max(need, 32 << 20)))

    t_index = (lambda l, b: (0, l, 0)) if Bt == 1 else (lambda l, b: (b, l, 0))

    # NOTE: when Lg % tile_l != 0 the padded tail rows of t/x are garbage, so
    # exp() may transiently produce inf/NaN in padded rows; those rows are
    # masked on store and never written back -- intentionally no guard here.
    out = pl.pallas_call(
        partial(_modulation_kernel, shift=float(shift), g=g),
        out_shape=jax.ShapeDtypeStruct((B, Lg, gD), x.dtype),
        grid=(n_lt, B),
        in_specs=[
            pl.BlockSpec((None, tile_l, g), t_index),                   # t (L-dependent only)
            pl.BlockSpec((g, gD), lambda l, b: (0, 0)),                 # -|deltas| expansion, resident
            pl.BlockSpec((None, tile_l, gD), lambda l, b: (b, l, 0)),   # x, streamed
        ],
        out_specs=pl.BlockSpec((None, tile_l, gD), lambda l, b: (b, l, 0)),
        compiler_params=pltpu.CompilerParams(
            dimension_semantics=("parallel", "parallel"),
            vmem_limit_bytes=vmem_limit,
        ),
        # x is input index 2; alias only when the caller's x is dead.
        input_output_aliases=({2: 0} if donate_x else {}),
    )(t_g, m, x_g)
    return out.reshape(B, L, D)


def make_deltas(d_model, fast_decay_pct=0.3, slow_decay_pct=1.5, target=0.01):
    """Deterministic parameter init matching ExponentialModulation.__init__."""
    max_decay = math.log(target) / fast_decay_pct
    min_decay = math.log(target) / slow_decay_pct
    deltas = jnp.linspace(min_decay, max_decay, d_model, dtype=jnp.float32)
    return deltas[None, None, :]  # (1, 1, d_model)


if __name__ == "__main__":
    shift = 0.05

    def ref_fn(t, x, deltas):
        decay = jnp.exp(-t * jnp.abs(deltas))
        return (x.astype(jnp.float32) * (decay + shift)).astype(x.dtype)

    key = jax.random.PRNGKey(0)
    k1, k2 = jax.random.split(key)

    # Case 1: Hyena-like small shapes, D < 128 -> lane-dense regroup path, bf16 x.
    B, L, D = 2, 16, 32
    deltas = make_deltas(D)
    t = jnp.linspace(0.0, 1.0, L, dtype=jnp.float32)[None, :, None]
    x = jax.random.normal(k1, (B, L, D), dtype=jnp.float32).astype(jnp.bfloat16)
    out = jax.block_until_ready(exponential_modulation(t, x, deltas, shift=shift))
    ref = ref_fn(t, x, deltas)
    assert out.shape == x.shape and out.dtype == x.dtype
    assert jnp.allclose(out.astype(jnp.float32), ref.astype(jnp.float32),
                        atol=1e-2, rtol=1e-2)

    # Case 2: D multiple of 128 -> g == 1 broadcast path, f32 x, tiled/partial L.
    B2, L2, D2 = 2, 72, 128
    deltas2 = make_deltas(D2)
    t2 = jnp.linspace(0.0, 1.0, L2, dtype=jnp.float32)[None, :, None]
    x2 = jax.random.normal(k2, (B2, L2, D2), dtype=jnp.float32)
    out2 = jax.block_until_ready(exponential_modulation(t2, x2, deltas2, shift=shift))
    ref2 = ref_fn(t2, x2, deltas2)
    assert jnp.allclose(out2, ref2, atol=1e-3, rtol=1e-3)

    # modulate=False passthrough
    assert jnp.array_equal(
        exponential_modulation(t, x, deltas, shift=shift, modulate=False), x)

    print("KERNEL_OK")
</pallas_src>

<mosaic_0001>
module attributes {stable_mosaic.version = 11 : i64} {
  func.func @_modulation_kernel(%arg0: i32, %arg1: i32, %arg2: memref<1x4x4xf32, #tpu.memory_space<vmem>>, %arg3: memref<4x128xf32, #tpu.memory_space<vmem>>, %arg4: memref<1x4x128xbf16, #tpu.memory_space<vmem>>, %arg5: memref<1x4x128xbf16, #tpu.memory_space<vmem>>) attributes {dimension_semantics = [#tpu.dimension_semantics<parallel>, #tpu.dimension_semantics<parallel>], iteration_bounds = array<i64: 1, 2>, scalar_prefetch = 0 : i64, scratch_operands = 0 : i64, tpu.core_type = #tpu.core_type<tc>, window_params = [{transform_indices = @transform_0, window_bounds = array<i64: 1, 4, 4>}, {pipeline_mode = #tpu.pipeline_mode<synchronous>, transform_indices = @transform_1, window_bounds = array<i64: 4, 128>}, {transform_indices = @transform_2, window_bounds = array<i64: 1, 4, 128>}, {transform_indices = @transform_3, window_bounds = array<i64: 1, 4, 128>}]} {
    %c0 = arith.constant 0 : index
    %c0_0 = arith.constant 0 : index
    %c0_1 = arith.constant 0 : index
    %0 = vector.load %arg2[%c0, %c0_0, %c0_1] : memref<1x4x4xf32, #tpu.memory_space<vmem>>, vector<1x4x4xf32>
    %1 = vector.shape_cast %0 : vector<1x4x4xf32> to vector<4x4xf32>
    %c0_2 = arith.constant 0 : index
    %c0_3 = arith.constant 0 : index
    %2 = vector.load %arg3[%c0_2, %c0_3] : memref<4x128xf32, #tpu.memory_space<vmem>>, vector<4x128xf32>
    %c0_4 = arith.constant 0 : index
    %c0_5 = arith.constant 0 : index
    %c0_6 = arith.constant 0 : index
    %3 = vector.load %arg4[%c0_4, %c0_5, %c0_6] : memref<1x4x128xbf16, #tpu.memory_space<vmem>>, vector<1x4x128xbf16>
    %4 = vector.shape_cast %3 : vector<1x4x128xbf16> to vector<4x128xbf16>
    %5 = arith.extf %4 : vector<4x128xbf16> to vector<4x128xf32>
    %cst = arith.constant dense<0.000000e+00> : vector<4x128xf32>
    %6 = tpu.matmul %1, %2, %cst {dimension_numbers = #tpu.dot_dimension_numbers<[1], [0], [0], [1], [0, 0, 1, 1], [], []>} : vector<4x4xf32>, vector<4x128xf32>, vector<4x128xf32> -> vector<4x128xf32>
    %7 = math.exp %6 : vector<4x128xf32>
    %cst_7 = arith.constant 5.000000e-02 : f32
    %8 = vector.broadcast %cst_7 : f32 to vector<4x128xf32>
    %9 = arith.addf %7, %8 : vector<4x128xf32>
    %10 = arith.mulf %5, %9 : vector<4x128xf32>
    %11 = arith.truncf %10 : vector<4x128xf32> to vector<4x128xbf16>
    %c0_8 = arith.constant 0 : index
    %c0_9 = arith.constant 0 : index
    %c0_10 = arith.constant 0 : index
    %12 = vector.load %arg5[%c0_8, %c0_9, %c0_10] : memref<1x4x128xbf16, #tpu.memory_space<vmem>>, vector<1x4x128xbf16>
    %13 = vector.shape_cast %12 : vector<1x4x128xbf16> to vector<4x128xbf16>
    %14 = vector.shape_cast %11 : vector<4x128xbf16> to vector<1x4x128xbf16>
    tpu.vector_store %arg5[%c0_8, %c0_9, %c0_10], %14 {strides = array<i32>} : memref<1x4x128xbf16, #tpu.memory_space<vmem>>, vector<1x4x128xbf16>,
    return
  }
  func.func @transform_0(%arg0: i32, %arg1: i32) -> (i32, i32, i32) {
    %c0_i32 = arith.constant 0 : i32
    %c0_i32_0 = arith.constant 0 : i32
    %c0_i32_1 = arith.constant 0 : i32
    return %c0_i32, %arg0, %c0_i32_0 : i32, i32, i32
  }
  func.func @transform_1(%arg0: i32, %arg1: i32) -> (i32, i32) {
    %c0_i32 = arith.constant 0 : i32
    %c0_i32_0 = arith.constant 0 : i32
    %c0_i32_1 = arith.constant 0 : i32
    return %c0_i32, %c0_i32_0 : i32, i32
  }
  func.func @transform_2(%arg0: i32, %arg1: i32) -> (i32, i32, i32) {
    %c0_i32 = arith.constant 0 : i32
    %c0_i32_0 = arith.constant 0 : i32
    return %arg1, %arg0, %c0_i32 : i32, i32, i32
  }
  func.func @transform_3(%arg0: i32, %arg1: i32) -> (i32, i32, i32) {
    %c0_i32 = arith.constant 0 : i32
    %c0_i32_0 = arith.constant 0 : i32
    return %arg1, %arg0, %c0_i32 : i32, i32, i32
  }
}

</mosaic_0001>

<bundles_post_ra>
// kernel: tpu_custom_call.1
= control target key start
LH: loop header
LB: loop body
LE: loop exit
PB: predicated region body
PF: predicated region fallthrough
CT: control target
= control target key end

     0   :  { %8 = vsyncpa [#allocation3], 0  ;;  %s882_s0 = inlined_call_operand.hbm [shape: f32[1,4,4], index: 0, kind: input, shape index: {}]   ;;  %s883_s1 = inlined_call_operand.hbm [shape: f32[4,128], index: 1, kind: input, shape index: {}]   ;;  %s884_s2 = inlined_call_operand.vmem [shape: bf16[2,4,128], index: 2, kind: input, shape index: {}]   ;;  %s885_s3 = inlined_call_operand.hbm [shape: bf16[2,4,128], index: 3, kind: output, shape index: {}]  }
   0x1   :  { %9 = vsyncpa [#allocation6], 0 }
   0x2   :  { %10 = vsyncpa [#allocation4], 0 }
   0x3   :  { %12 = vsyncpa [#allocation4 + $0x1], 0  ;;  %s695_s12 = smov 0   ;;  %s697_s13 = smov 0  }
   0x4   :  { %s699_s14 = smov 0   ;;  %s701_s15 = smov 0  }
   0x5   :  { %s703_s16 = smov 0   ;;  %s705_s17 = smov 0  }
   0x6 LB: > { %s422_s18 = sadd.s32 4294967295, %s668_s17   ;;  %s423_s19 = sadd.s32 4294967294, %s668_s17   ;;  %s668_s17 = sphi %s705_s17, %s18_s17   ;;  %s664_s16 = sphi %s703_s16, %s903_s16   ;;  %s660_s15 = sphi %s701_s15, %s902_s15   ;;  %s656_s14 = sphi %s699_s14, %s901_s14   ;;  %s652_s13 = sphi %s697_s13, %s900_s13   ;;  %s648_s12 = sphi %s695_s12, %s899_s12  }
   0x7   : > { %s27_s20 = sadd.s32 1, %s664_s16  ;;  %s114_s21 = sadd.s32 1, %s656_s14 }
   0x8   : > { %p28_p0 = scmp.ge.s32.totalorder %s27_s20, 2  ;;  %p124_p1 = scmp.ne.s32.totalorder %s656_s14, %s652_s13 }
   0x9   : > { %p125_p2 = scmp.eq.s32.totalorder %s422_s18, 1  ;;  %p130_p3 = scmp.ne.s32.totalorder %s652_s13, %s648_s12 }
   0xa   : > { %s905_s20 = smov (%p28_p0, %s27_s20), 0  ;;  %p131_p5 = scmp.eq.s32.totalorder %s423_s19, 1 }
   0xb   : > { %p735_p4 = por %p125_p2, %p124_p1  ;;  %s109_s23 = ssub.s32 %s664_s16, %s905_s20 }
   0xc   : > { %p424_p6 = scmp.ge.s32.totalorder %s668_s17, 1  ;;  %p112_p7 = scmp.eq.s32.totalorder %s109_s23, 0 }
   0xd   : > { %s890_s22 = scalar_select %p735_p4, 1, 0 }
   0xe   : > { %p742_p8 = por %p131_p5, %p130_p3  ;;  %p138_p9 = scmp.lt.s32.totalorder %s668_s17, 3 }
   0xf   : > { %s748_s25 = scalar_select %p112_p7, %s656_s14, %s114_s21  }
  0x10   : > { %s891_s24 = scalar_select %p742_p8, 1, 0 }
  0x11   : > { %p750_p10 = pnand %p424_p6, %p138_p9  ;;  %p754_p11 = scmp.eq.s32.totalorder %s422_s18, 0 }
  0x12   : > { %s670_s28 = smov [#allocation2]   ;;  %s671_s30 = smov [#allocation5]  }
  0x13   : > { %s892_s26 = scalar_select %p750_p10, 1, 0 }
  0x14   : > { %s893_s27 = scalar_select %p754_p11, 1, 0 }
  0x15   : > { %p456_p12 = pneg %p750_p10  ;;  %s153_s29 = sshll.u32 %s670_s28, 4  ;;  %s154_s29 = int_to_ptr.vmem [resolvable:$true] %s153_s29 }
  0x16   : > { %s164_s4 = sshll.u32 %s671_s30, 4  ;;  %s526_s8 = scalar_lea.hbm %s882_s0, 64  ;;  %s766_s4 = int_to_ptr.vmem [resolvable:$true] %s164_s4 }
  0x17   : > { %p762_p13 = pnand %p754_p11, %p456_p12  ;;  %p527_p0 = scmp.ne.s32.totalorder %s882_s0, %s526_s8 }
  0x18   : > { %p533_p5 = scmp.lt.u32.totalorder %s526_s8, %s882_s0 }
  0x19   : > { %p528_p1 = pneg %p762_p13 }
  0x1b   : > { %p529_p2 = pnand %p528_p1, %p527_p0 }
  0x1d   : > { %p530_p3 = pneg %p529_p2 }
  0x1f   : > { %p535_p6 = pnand %p533_p5, %p530_p3 }
  0x21   : > { %538 = shalt.err (!%p535_p6)
}
  0x22   : > { %s539_s19 = scalar_lea.vmem %s154_s29, 64  ;;  %p547_p8 = scmp.lt.s32.totalorder %s154_s29, %s154_s29 }
  0x23   : > { %p540_p7 = scmp.ne.s32.totalorder %s154_s29, %s539_s19  ;;  %p548_p4 = scmp.lt.s32.totalorder %s539_s19, %s539_s19 }
  0x25   : > { %p542_p9 = pnand %p540_p7, %p528_p1  ;;  %p549_p11 = por %p548_p4, %p547_p8 }
  0x27   : > { %p543_p12 = pneg %p542_p9 }
  0x29   : > { %p550_p10 = pnand %p549_p11, %p543_p12 }
  0x2b   : > { %553 = shalt.err (!%p550_p10)
}
  0x2c   : > { %459 = dma.hbm_to_vmem [thread:$0]  (!%p762_p13), %s882_s0, 64, %s154_s29, [#allocation3]  }
  0x2d   : > { %s554_s6 = scalar_lea.hbm %s883_s1, 64 }
  0x2e   : > { %p555_p0 = scmp.ne.s32.totalorder %s883_s1, %s554_s6  ;;  %p561_p10 = scmp.lt.u32.totalorder %s554_s6, %s883_s1 }
  0x30   : > { %p557_p4 = pnand %p555_p0, %p528_p1 }
  0x32   : > { %p558_p8 = pneg %p557_p4 }
  0x34   : > { %p563_p11 = pnand %p561_p10, %p558_p8 }
  0x36   : > { %566 = shalt.err (!%p563_p11)
}
  0x37   : > { %s567_s29 = scalar_lea.vmem %s766_s4, 64  ;;  %p575_p6 = scmp.lt.s32.totalorder %s766_s4, %s766_s4 }
  0x38   : > { %p568_p2 = scmp.ne.s32.totalorder %s766_s4, %s567_s29  ;;  %p576_p7 = scmp.lt.s32.totalorder %s567_s29, %s567_s29 }
  0x3a   : > { %p570_p3 = pnand %p568_p2, %p528_p1  ;;  %p577_p9 = por %p576_p7, %p575_p6 }
  0x3c   : > { %p571_p5 = pneg %p570_p3 }
  0x3e   : > { %p578_p12 = pnand %p577_p9, %p571_p5 }
  0x40   : > { %581 = shalt.err (!%p578_p12)
}
  0x41   : > { %462 = dma.hbm_to_vmem [thread:$0]  (!%p762_p13), %s883_s1, 64, %s766_s4, [#allocation6]  }
  0x42   : > { %p895_p0 = scmp.ne.s32.totalorder %s892_s26, 0 }
  0x43   : > { %p896_p4 = scmp.ne.s32.totalorder (!%p895_p0), %s893_s27, 0 }
  0x44   : > { %187 = sbr.rel (%p895_p0) target bundleno = 326 (0x146), region = 32 }
  0x4b   : > { %635 = dma.done.wait (%p896_p4), [#allocation3], 64  }
  0x4c   : > { %637 = vsyncadd (%p896_p4), [#allocation3], 4294967232 }
  0x4d   : > { %639 = dma.done.wait (%p896_p4), [#allocation6], 64  }
  0x4e   : > { %641 = vsyncadd (%p896_p4), [#allocation6], 4294967232  ;;  %v672_v0 = vmov 0.0   ;;  %vm673_vm0 = vmmov 0   ;;  %vm232_vm1 = vcmask 1043456   ;;  %vm228_vm2 = vcmask 31744  }
  0x4f   : > { %441 = vmatprep.subr.mxu0 %v672_v0  ;;  %443 = vmatprep.mubr.msk.f32.mxu0 %vm673_vm0, %v672_v0  ;;  %v225_v1 = vld [vmem:[#allocation5] sm:$0xf]  ;;  %v224_v2 = vld [vmem:[#allocation2] sm:$0xf]  ;;  %p217_p13 = scmp.lt.s32.totalorder %s660_s15, 1  ;;  %s214_s21 = sand.u32 1, %s652_s13  }
  0x50   : > { %442 = vmatpush3.msk.msra.mxu0 %vm232_vm1, %v225_v1  ;;  %s431_s23 = sshll.u32 %s214_s21, 1  ;;  %s436_s28 = sshll.u32 %s660_s15, 5 }
  0x51   : > { %444 = vmatmul.mubr.msk.f32.vlgmr.msra.gmra.mrb[0].mxu0 %vm228_vm2, %v224_v2  ;;  %s218_s26 = scalar_select %p217_p13, %s660_s15, 1 }
  0x52   : > { %s216_s30 = scalar_lea.vmem [#allocation7], %s431_s23  ;;  %s835_s9 = scalar_lea.hbm %s885_s3, %s436_s28 }
  0x53   : > { %s432_s27 = sshll.u32 %s218_s26, 1  ;;  %s327_s6 = sshll.u32 %s216_s30, 4  ;;  %s837_s6 = int_to_ptr.vmem [resolvable:$true] %s327_s6 }
  0x54   : > { %s223_s19 = scalar_lea.vmem %s884_s2, %s432_s27  ;;  %s313_s10 = scalar_lea.sflag [#allocation4], %s214_s21 }
  0x55   : > { %v226_v6 = vld [vmem:[%s223_s19] sm:$0x3]  ;;  %s582_s29 = scalar_lea.vmem %s837_s6, 32  ;;  %p897_p8 = scmp.ne.s32.totalorder %s890_s22, 0 }
  0x56   : > { %v227_v7 = vunpack.c.l.bf16 %v226_v6  ;;  %p583_p1 = scmp.ne.s32.totalorder %s837_s6, %s582_s29  ;;  %s674_s15 = smov [#allocation7]  }
  0x57   : > { %s586_s11 = sshll.u32 %s674_s15, 4  ;;  %s587_s11 = int_to_ptr.vmem [resolvable:$false] %s586_s11 }
  0x58   : > { %p584_p10 = pnand %p583_p1, %p897_p8  ;;  %s588_s18 = scalar_lea.vmem %s587_s11, 64 }
  0x59   : > { %p589_p2 = scmp.lt.s32.totalorder %s837_s6, %s587_s11  ;;  %p590_p3 = scmp.lt.s32.totalorder %s588_s18, %s582_s29 }
  0x5a   : > { %p585_p11 = pneg %p584_p10 }
  0x5b   : > { %p591_p5 = por %p590_p3, %p589_p2 }
  0x5d   : > { %p592_p6 = pnand %p591_p5, %p585_p11 }
 0x124   : > { %v302_v3 = vpop.f32.mrb[0].mxu0 }
 0x125   : > { %v306_v4 = vmul.f32 1.442695, %v302_v3  ;;  %v445_v5 = vpop.f32.mrb[1].mxu0 }
 0x127   : > { %524 = vpow2.f32 %v306_v4 }
 0x131   : > { %v525_v8 = vpop.eup %524 }
 0x132   : > { %v308_v9 = vadd.f32 0.05, %v525_v8 }
 0x134   : > { %v309_v10 = vmul.f32 %v308_v9, %v227_v7 }
 0x136   : > { %v310_v11 = vpack.c.bf16 %v309_v10, %v309_v10 }
 0x138   : > { %311 = vst [vmem:[%s216_s30] sm:$0x3] %v310_v11 }
 0x139   : > { %595 = shalt.err (!%p592_p6)
}
 0x13a   : > { %s596_s26 = scalar_lea.hbm %s835_s9, 32  ;;  %s600_s5 = scalar_lea.hbm %s885_s3, 64 }
 0x13b   : > { %p597_p7 = scmp.ne.s32.totalorder %s835_s9, %s596_s26  ;;  %p601_p0 = scmp.lt.u32.totalorder %s835_s9, %s885_s3 }
 0x13c   : > { %p602_p4 = scmp.lt.u32.totalorder %s600_s5, %s596_s26  ;;  %p604_p1 = scmp.lt.u32.totalorder %s596_s26, %s835_s9 }
 0x13d   : > { %p598_p9 = pnand %p597_p7, %p897_p8 }
 0x13e   : > { %p603_p13 = por %p602_p4, %p601_p0 }
 0x13f   : > { %p599_p12 = pneg %p598_p9 }
 0x140   : > { %p605_p10 = por %p604_p1, %p603_p13 }
 0x142   : > { %p606_p11 = pnand %p605_p10, %p599_p12 }
 0x144   : > { %609 = shalt.err (!%p606_p11)
}
 0x145   : > { %454 = dma.vmem_to_hbm [thread:$0]  (%p897_p8), %s837_s6, 32, %s835_s9, %s313_s10  }
 0x146 PF: > { %p471_p2 = scmp.ge.s32.totalorder %s668_s17, 2  ;;  %s339_s23 = sand.u32 1, %s648_s12  }
 0x147   : > { %p898_p3 = scmp.ne.s32.totalorder %s891_s24, 0  ;;  %s340_s28 = scalar_lea.sflag [#allocation4], %s339_s23 }
 0x149   : > { %p464_p5 = pnand %p471_p2, %p898_p3 }
 0x14b   : > { %643 = dma.done.wait (!%p464_p5), %s340_s28, 32  }
 0x14c   : > { %645 = vsyncadd (!%p464_p5), %s340_s28, 4294967264  ;;  %s18_s17 = sadd.s32 1, %s668_s17   ;;  %s899_s12 = smov %s652_s13 }
 0x14d   : > { %p15_p6 = scmp.ge.s32.totalorder %s18_s17, 4   ;;  %s900_s13 = smov %s656_s14 }
 0x14e   : > { %s901_s14 = smov %s748_s25  ;;  %s902_s15 = smov %s664_s16 }
 0x14f   : > { %s903_s16 = smov %s905_s20  ;;  %17 = sbr.rel (!%p15_p6) target bundleno = 6 (0x6), region = 77 }
 0x156   :  { %345 = vsyncpa [#allocation3], 1 }
 0x157   :  { %347 = vsyncpa [#allocation3 + $0x1], 1 }
 0x158   :  { %348 = vsyncpa [#allocation6], 1 }
 0x159   :  { %349 = vsyncpa [#allocation4], 1 }
 0x15a   :  { %351 = vsyncpa [#allocation4 + $0x1], 1 }

</bundles_post_ra>
